<compile_context>
chip_gen: v5e
topology: v5e:2x2
jax: 0.10.0
libtpu: 0.0.40
codegen_flags: <defaults>
</compile_context>

<pallas_src>
import functools

import jax
import jax.numpy as jnp
from jax.experimental import pallas as pl
from jax.experimental.pallas import tpu as pltpu

LANE = 128     # TPU lane width: hidden/output feature dims padded to this
SUBLANE = 8    # f32 sublane granularity for the batch (second-to-last) dim


def _round_up(n, m):
    return (n + m - 1) // m * m


def _mlp_kernel(x_ref, w1_ref, b1_ref, w2_ref, b2_ref, o_ref):
    """Fused Linear -> ReLU -> Linear on one batch tile (all operands in VMEM)."""
    x = x_ref[...]
    # Layer 1: (tb, IN) @ (IN, H1p) on the MXU, f32 accumulation.
    h = jnp.dot(x.astype(w1_ref.dtype), w1_ref[...],
                preferred_element_type=jnp.float32)
    h = jnp.maximum(h + b1_ref[...], 0.0)            # bias + ReLU on the VPU
    # Layer 2: (tb, H1p) @ (H1p, OUTp), f32 accumulation.
    y = jnp.dot(h.astype(w2_ref.dtype), w2_ref[...],
                preferred_element_type=jnp.float32)
    o_ref[...] = (y + b2_ref[...]).astype(o_ref.dtype)


def prepare_params(w1, b1, w2, b2, param_dtype=None):
    """One-time conversion of torch-layout params to kernel layout.

    w1: (h1, in), b1: (h1,), w2: (out, h1), b2: (out,)  [torch nn.Linear layout]
    Returns:
      w1p: (in,  h1_pad)   (optionally cast to param_dtype, e.g. bf16)
      b1p: (1,   h1_pad)   f32
      w2p: (h1_pad, out_pad)
      b2p: (1,   out_pad)  f32
    Padded rows/columns are zero, so padded hidden lanes are relu(0)=0 and
    padded output lanes are exactly 0 (sliced off by the wrapper).
    """
    w1 = jnp.asarray(w1); b1 = jnp.asarray(b1)
    w2 = jnp.asarray(w2); b2 = jnp.asarray(b2)
    h1, in_f = w1.shape
    out_f, _ = w2.shape
    h1_pad = _round_up(h1, LANE)
    out_pad = _round_up(out_f, LANE)

    w1p = jnp.pad(w1.T, ((0, 0), (0, h1_pad - h1)))              # (in, h1_pad)
    w2p = jnp.pad(w2.T, ((0, h1_pad - h1), (0, out_pad - out_f)))  # (h1_pad, out_pad)
    b1p = jnp.pad(b1, (0, h1_pad - h1)).reshape(1, h1_pad).astype(jnp.float32)
    b2p = jnp.pad(b2, (0, out_pad - out_f)).reshape(1, out_pad).astype(jnp.float32)
    if param_dtype is not None:
        w1p = w1p.astype(param_dtype)
        w2p = w2p.astype(param_dtype)
    return w1p, b1p, w2p, b2p


@functools.partial(jax.jit, static_argnames=("out_features", "block_b"))
def linear_q_net_forward(x, w1p, b1p, w2p, b2p, *, out_features, block_b=256):
    """Forward pass.  x: (B, in_features); params from prepare_params()."""
    B, in_f = x.shape
    in_f_w, h1p = w1p.shape
    h1p2, outp = w2p.shape
    assert in_f == in_f_w and h1p == h1p2, "param/input shapes inconsistent"

    # Batch tile: sublane-aligned, capped at block_b (use block_b=128 on v5e).
    tb = min(block_b, _round_up(B, SUBLANE))
    b_pad = _round_up(B, tb)
    if b_pad != B:
        x = jnp.pad(x, ((0, b_pad - B), (0, 0)))
    grid = (b_pad // tb,)

    flops = 2 * b_pad * in_f * h1p + 2 * b_pad * h1p * outp
    bytes_accessed = (
        x.size * x.dtype.itemsize
        + w1p.size * w1p.dtype.itemsize + b1p.size * b1p.dtype.itemsize
        + w2p.size * w2p.dtype.itemsize + b2p.size * b2p.dtype.itemsize
        + b_pad * outp * x.dtype.itemsize)

    out = pl.pallas_call(
        _mlp_kernel,
        out_shape=jax.ShapeDtypeStruct((b_pad, outp), x.dtype),
        grid_spec=pl.GridSpec(
            grid=grid,
            in_specs=[
                pl.BlockSpec((tb, in_f), lambda i: (i, 0)),     # x tile
                pl.BlockSpec((in_f, h1p), lambda i: (0, 0)),    # W1 (resident)
                pl.BlockSpec((1, h1p), lambda i: (0, 0)),       # b1 (resident)
                pl.BlockSpec((h1p, outp), lambda i: (0, 0)),    # W2 (resident)
                pl.BlockSpec((1, outp), lambda i: (0, 0)),      # b2 (resident)
            ],
            out_specs=pl.BlockSpec((tb, outp), lambda i: (i, 0)),
        ),
        compiler_params=pltpu.CompilerParams(
            dimension_semantics=("parallel",)),   # batch axis -> 2 TCs on v7x
        cost_estimate=pl.CostEstimate(
            flops=flops, transcendentals=0, bytes_accessed=bytes_accessed),
    )(x, w1p, b1p, w2p, b2p)

    return out[:B, :out_features]


def init_params(key, in_features, hidden1, out_features, dtype=jnp.float32):
    """Deterministic init mimicking nn.Linear's uniform(-1/sqrt(fan_in), +)."""
    k1, k2, k3, k4 = jax.random.split(key, 4)
    bound1 = 1.0 / jnp.sqrt(in_features)
    bound2 = 1.0 / jnp.sqrt(hidden1)
    w1 = jax.random.uniform(k1, (hidden1, in_features), dtype,
                            minval=-bound1, maxval=bound1)
    b1 = jax.random.uniform(k2, (hidden1,), dtype,
                            minval=-bound1, maxval=bound1)
    w2 = jax.random.uniform(k3, (out_features, hidden1), dtype,
                            minval=-bound2, maxval=bound2)
    b2 = jax.random.uniform(k4, (out_features,), dtype,
                            minval=-bound2, maxval=bound2)
    return w1, b1, w2, b2


if __name__ == "__main__":
    key = jax.random.PRNGKey(0)
    kx, kp, kx2 = jax.random.split(key, 3)

    # Small shapes consistent with Linear_Q_net(input=16, hidden1=32, output=8)
    B, IN, H1, OUT = 8, 16, 32, 8
    x = jax.random.normal(kx, (B, IN), jnp.float32)
    w1, b1, w2, b2 = init_params(kp, IN, H1, OUT)

    def torch_ref(xx):
        return jnp.maximum(xx @ w1.T + b1, 0.0) @ w2.T + b2

    # --- f32 parameters (bit-faithful to the torch module) -------------------
    params_f32 = prepare_params(w1, b1, w2, b2)
    out = jax.block_until_ready(
        linear_q_net_forward(x, *params_f32, out_features=OUT))
    assert out.shape == (B, OUT)
    assert jnp.allclose(out, torch_ref(x), atol=1e-5, rtol=1e-5)

    # --- larger, non-aligned batch exercises batch tiling + pad/slice path ---
    xb = jax.random.normal(kx2, (300, IN), jnp.float32)
    outb = jax.block_until_ready(
        linear_q_net_forward(xb, *params_f32, out_features=OUT))
    assert outb.shape == (300, OUT)
    assert jnp.allclose(outb, torch_ref(xb), atol=1e-4, rtol=1e-4)

    # --- bf16-stored weights: half the weight DMA, f32 MXU accumulation ------
    params_bf16 = prepare_params(w1, b1, w2, b2, param_dtype=jnp.bfloat16)
    out_bf16 = jax.block_until_ready(
        linear_q_net_forward(x, *params_bf16, out_features=OUT))
    assert out_bf16.shape == (B, OUT)
    assert jnp.allclose(out_bf16, torch_ref(x), atol=1e-1, rtol=1e-1)

    print("KERNEL_OK")
</pallas_src>

<mosaic_0001>
module attributes {stable_mosaic.version = 11 : i64} {
  func.func @_mlp_kernel(%arg0: i32, %arg1: memref<8x16xf32, #tpu.memory_space<vmem>>, %arg2: memref<16x128xf32, #tpu.memory_space<vmem>>, %arg3: memref<1x128xf32, #tpu.memory_space<vmem>>, %arg4: memref<128x128xf32, #tpu.memory_space<vmem>>, %arg5: memref<1x128xf32, #tpu.memory_space<vmem>>, %arg6: memref<8x128xf32, #tpu.memory_space<vmem>>) attributes {dimension_semantics = [#tpu.dimension_semantics<parallel>], iteration_bounds = array<i64: 1>, scalar_prefetch = 0 : i64, scratch_operands = 0 : i64, tpu.core_type = #tpu.core_type<tc>, window_params = [{transform_indices = @transform_0, window_bounds = array<i64: 8, 16>}, {pipeline_mode = #tpu.pipeline_mode<synchronous>, transform_indices = @transform_1, window_bounds = array<i64: 16, 128>}, {pipeline_mode = #tpu.pipeline_mode<synchronous>, transform_indices = @transform_2, window_bounds = array<i64: 1, 128>}, {pipeline_mode = #tpu.pipeline_mode<synchronous>, transform_indices = @transform_3, window_bounds = array<i64: 128, 128>}, {pipeline_mode = #tpu.pipeline_mode<synchronous>, transform_indices = @transform_4, window_bounds = array<i64: 1, 128>}, {transform_indices = @transform_5, window_bounds = array<i64: 8, 128>}]} {
    %c0 = arith.constant 0 : index
    %c0_0 = arith.constant 0 : index
    %0 = vector.load %arg1[%c0, %c0_0] : memref<8x16xf32, #tpu.memory_space<vmem>>, vector<8x16xf32>
    %c0_1 = arith.constant 0 : index
    %c0_2 = arith.constant 0 : index
    %1 = vector.load %arg2[%c0_1, %c0_2] : memref<16x128xf32, #tpu.memory_space<vmem>>, vector<16x128xf32>
    %cst = arith.constant dense<0.000000e+00> : vector<8x128xf32>
    %2 = tpu.matmul %0, %1, %cst {dimension_numbers = #tpu.dot_dimension_numbers<[1], [0], [0], [1], [0, 0, 1, 1], [], []>} : vector<8x16xf32>, vector<16x128xf32>, vector<8x128xf32> -> vector<8x128xf32>
    %c0_3 = arith.constant 0 : index
    %c0_4 = arith.constant 0 : index
    %3 = vector.load %arg3[%c0_3, %c0_4] : memref<1x128xf32, #tpu.memory_space<vmem>>, vector<1x128xf32>
    %4 = vector.broadcast %3 : vector<1x128xf32> to vector<8x128xf32>
    %5 = arith.addf %2, %4 : vector<8x128xf32>
    %cst_5 = arith.constant 0.000000e+00 : f32
    %6 = vector.broadcast %cst_5 : f32 to vector<8x128xf32>
    %7 = arith.maximumf %5, %6 : vector<8x128xf32>
    %c0_6 = arith.constant 0 : index
    %c0_7 = arith.constant 0 : index
    %8 = vector.load %arg4[%c0_6, %c0_7] : memref<128x128xf32, #tpu.memory_space<vmem>>, vector<128x128xf32>
    %cst_8 = arith.constant dense<0.000000e+00> : vector<8x128xf32>
    %9 = tpu.matmul %7, %8, %cst_8 {dimension_numbers = #tpu.dot_dimension_numbers<[1], [0], [0], [1], [0, 0, 1, 1], [], []>} : vector<8x128xf32>, vector<128x128xf32>, vector<8x128xf32> -> vector<8x128xf32>
    %c0_9 = arith.constant 0 : index
    %c0_10 = arith.constant 0 : index
    %10 = vector.load %arg5[%c0_9, %c0_10] : memref<1x128xf32, #tpu.memory_space<vmem>>, vector<1x128xf32>
    %11 = vector.broadcast %10 : vector<1x128xf32> to vector<8x128xf32>
    %12 = arith.addf %9, %11 : vector<8x128xf32>
    %c0_11 = arith.constant 0 : index
    %c0_12 = arith.constant 0 : index
    %13 = vector.load %arg6[%c0_11, %c0_12] : memref<8x128xf32, #tpu.memory_space<vmem>>, vector<8x128xf32>
    tpu.vector_store %arg6[%c0_11, %c0_12], %12 {strides = array<i32>} : memref<8x128xf32, #tpu.memory_space<vmem>>, vector<8x128xf32>,
    return
  }
  func.func @transform_0(%arg0: i32) -> (i32, i32) {
    %c0_i32 = arith.constant 0 : i32
    %c0_i32_0 = arith.constant 0 : i32
    return %arg0, %c0_i32 : i32, i32
  }
  func.func @transform_1(%arg0: i32) -> (i32, i32) {
    %c0_i32 = arith.constant 0 : i32
    %c0_i32_0 = arith.constant 0 : i32
    %c0_i32_1 = arith.constant 0 : i32
    return %c0_i32, %c0_i32_0 : i32, i32
  }
  func.func @transform_2(%arg0: i32) -> (i32, i32) {
    %c0_i32 = arith.constant 0 : i32
    %c0_i32_0 = arith.constant 0 : i32
    %c0_i32_1 = arith.constant 0 : i32
    return %c0_i32, %c0_i32_0 : i32, i32
  }
  func.func @transform_3(%arg0: i32) -> (i32, i32) {
    %c0_i32 = arith.constant 0 : i32
    %c0_i32_0 = arith.constant 0 : i32
    %c0_i32_1 = arith.constant 0 : i32
    return %c0_i32, %c0_i32_0 : i32, i32
  }
  func.func @transform_4(%arg0: i32) -> (i32, i32) {
    %c0_i32 = arith.constant 0 : i32
    %c0_i32_0 = arith.constant 0 : i32
    %c0_i32_1 = arith.constant 0 : i32
    return %c0_i32, %c0_i32_0 : i32, i32
  }
  func.func @transform_5(%arg0: i32) -> (i32, i32) {
    %c0_i32 = arith.constant 0 : i32
    %c0_i32_0 = arith.constant 0 : i32
    return %arg0, %c0_i32 : i32, i32
  }
}

</mosaic_0001>

<bundles_post_ra>
// kernel: linear_q_net_forward.1
= control target key start
LH: loop header
LB: loop body
LE: loop exit
PB: predicated region body
PF: predicated region fallthrough
CT: control target
= control target key end

     0   :  { %10 = vsyncpa [#allocation3], 0  ;;  %s322_s0 = inlined_call_operand.hbm [shape: f32[8,16], index: 0, kind: input, shape index: {}]   ;;  %s323_s1 = inlined_call_operand.hbm [shape: f32[16,128], index: 1, kind: input, shape index: {}]   ;;  %s324_s2 = inlined_call_operand.vmem [shape: f32[1,128], index: 2, kind: input, shape index: {}]   ;;  %s325_s3 = inlined_call_operand.hbm [shape: f32[128,128], index: 3, kind: input, shape index: {}]   ;;  %s326_s4 = inlined_call_operand.vmem [shape: f32[1,128], index: 4, kind: input, shape index: {}]   ;;  %s327_s5 = inlined_call_operand.hbm [shape: f32[8,128], index: 5, kind: output, shape index: {}]  }
   0x1   :  { %11 = vsyncpa [#allocation6], 0  ;;  %s28_s20 = sshll.u32 %s323_s1, 4  ;;  %s29_s20 = int_to_ptr.hbm [resolvable:$true] %s28_s20 }
   0x2   :  { %12 = vsyncpa [#allocation4], 0  ;;  %s268_s21 = smov [#allocation5]   ;;  %s18_s25 = sshll.u32 %s322_s0, 4  ;;  %s19_s25 = int_to_ptr.hbm [resolvable:$true] %s18_s25 }
   0x3   :  { %s30_s22 = sshll.u32 %s268_s21, 4  ;;  %s269_s26 = smov 128   ;;  %s31_s22 = int_to_ptr.vmem [resolvable:$true] %s30_s22 }
   0x4   :  { %s270_s27 = smov 8   ;;  %s271_s28 = smov [#allocation2]  }
   0x5   :  { %36 = dma.hbm_to_vmem [thread:$0]  %s29_s20, 256, %s31_s22, [#allocation6], %s269_s26, %s269_s26, %s270_s27  }
   0x6   :  { %s20_s29 = sshll.u32 %s271_s28, 4  ;;  %s43_s7 = sshll.u32 %s325_s3, 4  ;;  %s21_s29 = int_to_ptr.vmem [resolvable:$true] %s20_s29  ;;  %s44_s7 = int_to_ptr.hbm [resolvable:$true] %s43_s7 }
   0x7   :  { %23 = dma.hbm_to_vmem [thread:$0]  %s19_s25, 128, %s21_s29, [#allocation3]  }
   0x8   :  { %s272_s1 = smov [#allocation7]  }
   0x9   :  { %s45_s8 = sshll.u32 %s272_s1, 4  ;;  %s46_s8 = int_to_ptr.vmem [resolvable:$true] %s45_s8 }
   0xa   :  { %51 = dma.hbm_to_vmem [thread:$0]  %s44_s7, 2048, %s46_s8, [#allocation6], %s269_s26, %s269_s26, %s270_s27  }
   0xb   :  { %262 = dma.done.wait [#allocation3], 128  }
   0xc   :  { %263 = vsyncadd [#allocation3], 4294967168 }
   0xd   :  { %264 = dma.done.wait [#allocation6], 2304  }
   0xe   :  { %265 = vsyncadd [#allocation6], 4294964992  ;;  %v68_v0 = vld [vmem:[#allocation5 + $0x8] sm:$0xff]  ;;  %v67_v1 = vld [vmem:[#allocation5] sm:$0xff]  ;;  %vm73_vm0 = vcmask 130048   ;;  %s273_s11 = smov [#allocation8]  }
   0xf   :  { %91 = vmatpush.msra.mxu0 %v68_v0  ;;  %v66_v2 = vld [vmem:[#allocation2] sm:$0xff]  ;;  %v113_v3 = vld [vmem:[#allocation7 + $0x78] sm:$0xff]  ;;  %v112_v4 = vld [vmem:[#allocation7 + $0x70] sm:$0xff]  ;;  %s144_s12 = sshll.u32 %s273_s11, 4  ;;  %s146_s15 = sshll.u32 %s327_s5, 4  ;;  %s145_s12 = int_to_ptr.vmem [resolvable:$true] %s144_s12  ;;  %s147_s15 = int_to_ptr.hbm [resolvable:$true] %s146_s15 }
  0x10   :  { %118 = vmatpush.msra.mxu1 %v113_v3  ;;  %v111_v5 = vld [vmem:[#allocation7 + $0x68] sm:$0xff]  ;;  %v110_v6 = vld [vmem:[#allocation7 + $0x60] sm:$0xff]  ;;  %v109_v7 = vld [vmem:[#allocation7 + $0x58] sm:$0xff] }
  0x11   :  { %92 = vmatpush.msra.mxu0 %v67_v1  ;;  %v108_v8 = vld [vmem:[#allocation7 + $0x50] sm:$0xff]  ;;  %v107_v9 = vld [vmem:[#allocation7 + $0x48] sm:$0xff]  ;;  %v106_v10 = vld [vmem:[#allocation7 + $0x40] sm:$0xff] }
  0x12   :  { %157 = vmatmul.msk.f32.vlgmr.msra.gmra.mxu0 %vm73_vm0, %v66_v2  ;;  %119 = vmatpush.msra.mxu1 %v112_v4  ;;  %v105_v11 = vld [vmem:[#allocation7 + $0x38] sm:$0xff]  ;;  %v104_v12 = vld [vmem:[#allocation7 + $0x30] sm:$0xff]  ;;  %v103_v13 = vld [vmem:[#allocation7 + $0x28] sm:$0xff] }
  0x13   :  { %v102_v14 = vld [vmem:[#allocation7 + $0x20] sm:$0xff]  ;;  %v101_v15 = vld [vmem:[#allocation7 + $0x18] sm:$0xff]  ;;  %v100_v16 = vld [vmem:[#allocation7 + $0x10] sm:$0xff] }
  0x14   :  { %120 = vmatpush.msra.mxu1 %v111_v5  ;;  %v99_v17 = vld [vmem:[#allocation7 + $0x8] sm:$0xff]  ;;  %v98_v18 = vld [vmem:[#allocation7] sm:$0xff] }
  0x15   :  { %v164_v19 = vld [vmem:[%s324_s2] ss:$0 sm:$0xff] }
  0x16   :  { %121 = vmatpush.msra.mxu1 %v110_v6  ;;  %v165_v23 = vld [vmem:[%s326_s4] ss:$0 sm:$0xff] }
  0x18   :  { %122 = vmatpush.msra.mxu1 %v109_v7 }
  0x1a   :  { %123 = vmatpush.msra.mxu1 %v108_v8 }
  0x1c   :  { %124 = vmatpush.msra.mxu1 %v107_v9 }
  0x1e   :  { %125 = vmatpush.msra.mxu1 %v106_v10 }
  0x20   :  { %126 = vmatpush.msra.mxu1 %v105_v11 }
  0x22   :  { %127 = vmatpush.msra.mxu1 %v104_v12 }
  0x24   :  { %128 = vmatpush.msra.mxu1 %v103_v13 }
  0x26   :  { %129 = vmatpush.msra.mxu1 %v102_v14 }
  0x28   :  { %130 = vmatpush.msra.mxu1 %v101_v15 }
  0x2a   :  { %131 = vmatpush.msra.mxu1 %v100_v16 }
  0x2c   :  { %132 = vmatpush.msra.mxu1 %v99_v17 }
  0x2e   :  { %133 = vmatpush.msra.mxu1 %v98_v18 }
  0x8f   :  { %v94_v20 = vpop.f32.mrf.mxu0 }
  0x90   :  { %v95_v21 = vadd.f32 %v164_v19, %v94_v20 }
  0x92   :  { %v97_v22 = vmax.f32 %v95_v21, 0.0 }
  0x94   :  { %134 = vmatmul.f32.vlgmr.msra.gmra.mxu1 %v97_v22 }
 0x111   :  { %v135_v24 = vpop.f32.mrf.mxu1 }
 0x112   :  { %v136_v25 = vadd.f32 %v165_v23, %v135_v24 }
 0x114   :  { %138 = vst [vmem:[#allocation8] sm:$0xff] %v136_v25 }
 0x115   :  { %149 = dma.vmem_to_hbm [thread:$0]  %s145_s12, 128, %s147_s15, [#allocation4]  }
 0x116   :  { %266 = dma.done.wait [#allocation4], 128  }
 0x117   :  { %267 = vsyncadd [#allocation4], 4294967168 }
 0x118   :  { %154 = vsyncpa [#allocation3], 1 }
 0x119   :  { %155 = vsyncpa [#allocation6], 1 }
 0x11a   :  { %156 = vsyncpa [#allocation4], 1 }

</bundles_post_ra>
